<compile_context>
chip_gen: v7x
topology: tpu7x:2x2x1
jax: 0.10.0
libtpu: 0.0.40
codegen_flags: <defaults>
</compile_context>

<pallas_src>
import math
import functools

import numpy as np
import jax
import jax.numpy as jnp
from jax.experimental import pallas as pl
from jax.experimental.pallas import tpu as pltpu

EPS = 1e-5
NEG_INF = -1e30


# --------------------------------------------------------------------------
# shared math (pure jnp, usable both inside kernels and in the reference)
# --------------------------------------------------------------------------
def _layer_norm(x, g):
    # F.layer_norm over last dim, weight `g`, no bias, eps=1e-5 (f32 stats)
    mu = jnp.mean(x, axis=-1, keepdims=True)
    xc = x - mu
    var = jnp.mean(xc * xc, axis=-1, keepdims=True)
    return xc * jax.lax.rsqrt(var + EPS) * g


def _gelu_exact(x):
    # torch nn.GELU() default: exact erf-based GELU
    return 0.5 * x * (1.0 + jax.lax.erf(x * (1.0 / math.sqrt(2.0))))


# --------------------------------------------------------------------------
# generation-aware knobs
# --------------------------------------------------------------------------
def _vmem_limit_bytes():
    """~80% of physical VMEM, capped at 110 MiB (=> ~102 MiB on v5e/v6e, ~51 MiB on v7x)."""
    phys = 128 * 1024 * 1024
    try:
        info = pltpu.get_tpu_info()
        phys = int(getattr(info, "vmem_capacity_bytes", phys))
    except Exception:
        pass
    return min(int(phys * 0.80), 110 * 1024 * 1024)


def _pick_seq_tile(T, vmem_limit):
    """Largest seq tile dividing T; allow 256 only when VMEM is plentiful (v5e/v6e)."""
    cap = 256 if vmem_limit >= 96 * 1024 * 1024 else 128
    for t in (256, 128, 64, 32, 16, 8):
        if t <= min(cap, T) and T % t == 0:
            return t
    return T  # fall back to a full-extent block (always legal)


def _pick_head_group(n_head, head_dim):
    """Smallest head-group size G dividing n_head with (G*head_dim) % 128 == 0."""
    for g in range(1, n_head + 1):
        if n_head % g == 0 and (g * head_dim) % 128 == 0:
            return g
    return None


# --------------------------------------------------------------------------
# single-buffered weight BlockSpecs (probed once; falls back to default)
# --------------------------------------------------------------------------
_SINGLE_BUFFER_OK = None


def _probe_single_buffer():
    if not hasattr(pl, "Buffered"):
        return False

    def _k(x_ref, w_ref, o_ref):
        o_ref[...] = x_ref[...] + w_ref[...]

    try:
        out = pl.pallas_call(
            _k,
            out_shape=jax.ShapeDtypeStruct((16, 128), jnp.float32),
            grid=(2,),
            in_specs=[
                pl.BlockSpec((8, 128), lambda i: (i, 0)),
                pl.BlockSpec((8, 128), lambda i: (0, 0),
                             pipeline_mode=pl.Buffered(1)),
            ],
            out_specs=pl.BlockSpec((8, 128), lambda i: (i, 0)),
        )(jnp.zeros((16, 128), jnp.float32), jnp.ones((8, 128), jnp.float32))
        jax.block_until_ready(out)
        return bool(jnp.all(out == 1.0))
    except Exception:
        return False


def _single_buffer_supported():
    global _SINGLE_BUFFER_OK
    if _SINGLE_BUFFER_OK is None:
        _SINGLE_BUFFER_OK = _probe_single_buffer()
    return _SINGLE_BUFFER_OK


def _weight_spec(block_shape, index_map):
    # Grid-invariant weights: Pallas already avoids re-fetching constant-index
    # blocks; Buffered(1) additionally halves their VMEM reservation (v7x).
    if _single_buffer_supported():
        return pl.BlockSpec(block_shape, index_map, pipeline_mode=pl.Buffered(1))
    return pl.BlockSpec(block_shape, index_map)


# --------------------------------------------------------------------------
# Pallas kernels
# --------------------------------------------------------------------------
def ln_qkv_kernel(x_ref, g_ref, w_ref, o_ref):
    """LN1 + QKV projection for one (batch, T-tile); single lane-dense (tq,3C) store."""
    h = _layer_norm(x_ref[0].astype(jnp.float32), g_ref[...]).astype(jnp.bfloat16)
    o_ref[0] = jnp.dot(h, w_ref[...],
                       preferred_element_type=jnp.float32).astype(o_ref.dtype)


def flash_attn_kernel(q_ref, k_ref, v_ref, o_ref, m_ref, l_ref, acc_ref,
                      *, sm_scale, n_group, head_dim):
    """Causal flash attention over a head group.

    grid = (B, n_head_groups, q-tiles, k-tiles), k-tiles innermost ('arbitrary').
    q/k/v refs are (1, tile, n_group*head_dim) slices of the (B,T,3C) qkv slab.
    Interior tiles (ki < qi) skip the causal mask entirely; fully masked tiles
    (ki > qi) skip compute, and their DMA is skipped via the clamped index_map.
    """
    qi = pl.program_id(2)
    ki = pl.program_id(3)
    nk = pl.num_programs(3)

    @pl.when(ki == 0)
    def _init():
        m_ref[...] = jnp.full_like(m_ref, NEG_INF)
        l_ref[...] = jnp.zeros_like(l_ref)
        acc_ref[...] = jnp.zeros_like(acc_ref)

    def _process(masked):
        q = q_ref[0]                                       # (tq, G*hd) bf16
        k = k_ref[0]                                       # (tk, G*hd) bf16
        v = v_ref[0]                                       # (tk, G*hd) bf16
        tq, tk = q.shape[0], k.shape[0]
        if masked:
            # diagonal tile: q_start == k_start, mask in local coordinates
            row = jax.lax.broadcasted_iota(jnp.int32, (tq, tk), 0)
            col = jax.lax.broadcasted_iota(jnp.int32, (tq, tk), 1)
            keep = col <= row
        for g in range(n_group):                           # static loop, small G
            qg = q[:, g * head_dim:(g + 1) * head_dim]
            kg = k[:, g * head_dim:(g + 1) * head_dim]
            vg = v[:, g * head_dim:(g + 1) * head_dim]
            s = jax.lax.dot_general(qg, kg, (((1,), (1,)), ((), ())),
                                    preferred_element_type=jnp.float32) * sm_scale
            if masked:
                s = jnp.where(keep, s, NEG_INF)
            m_prev = m_ref[g]                              # (tq, 1) f32
            m_new = jnp.maximum(m_prev, jnp.max(s, axis=-1, keepdims=True))
            alpha = jnp.exp(m_prev - m_new)
            p = jnp.exp(s - m_new)                         # (tq, tk) f32
            l_ref[g] = alpha * l_ref[g] + jnp.sum(p, axis=-1, keepdims=True)
            acc_ref[g] = alpha * acc_ref[g] + jnp.dot(
                p.astype(jnp.bfloat16), vg, preferred_element_type=jnp.float32)
            m_ref[g] = m_new

    @pl.when(ki < qi)          # strictly-lower tiles: no mask VALU work at all
    def _interior():
        _process(False)

    @pl.when(ki == qi)         # diagonal tile: apply the causal mask
    def _diagonal():
        _process(True)

    @pl.when(ki == nk - 1)
    def _finalize():
        inv_l = pl.reciprocal(l_ref[...], approx=True)     # EUP slot, off the VALU
        heads = [(acc_ref[g] * inv_l[g]).astype(o_ref.dtype) for g in range(n_group)]
        out = heads[0] if n_group == 1 else jnp.concatenate(heads, axis=-1)
        o_ref[0] = out                                      # single lane-dense store


def attn_proj_mlp_kernel(x_ref, y_ref, wap_ref, g2_ref, wfc_ref, wmp_ref, o_ref):
    """attn c_proj + residual, LN2 + MLP + residual, for one (batch, T-tile)."""
    x = x_ref[0].astype(jnp.float32)                       # bf16 residual -> f32
    x = x + jnp.dot(y_ref[0], wap_ref[...], preferred_element_type=jnp.float32)
    h = _layer_norm(x, g2_ref[...]).astype(jnp.bfloat16)
    fc = jnp.dot(h, wfc_ref[...], preferred_element_type=jnp.float32)
    fc = _gelu_exact(fc).astype(jnp.bfloat16)
    x = x + jnp.dot(fc, wmp_ref[...], preferred_element_type=jnp.float32)
    o_ref[0] = x.astype(o_ref.dtype)                       # carry residual in bf16


def lm_head_kernel(x_ref, g_ref, w_ref, o_ref, h_ref):
    """Final LayerNorm (computed once, cached in VMEM scratch) + tiled lm_head matmul."""
    @pl.when(pl.program_id(0) == 0)
    def _ln_once():
        h_ref[...] = _layer_norm(x_ref[...].astype(jnp.float32),
                                 g_ref[...]).astype(jnp.bfloat16)
    o_ref[...] = jnp.dot(h_ref[...], w_ref[...], preferred_element_type=jnp.float32)


# --------------------------------------------------------------------------
# Pallas call wrappers
# --------------------------------------------------------------------------
def _ln_qkv(x, g, wqkv, tq, vmem_limit):
    B, T, C = x.shape
    cost = pl.CostEstimate(
        flops=int(2 * B * T * C * 3 * C), transcendentals=0,
        bytes_accessed=int(2 * B * T * C + 2 * 3 * C * C + 2 * B * T * 3 * C))
    return pl.pallas_call(
        ln_qkv_kernel,
        out_shape=jax.ShapeDtypeStruct((B, T, 3 * C), jnp.bfloat16),
        grid=(B, T // tq),
        in_specs=[
            pl.BlockSpec((1, tq, C), lambda b, t: (b, t, 0)),
            _weight_spec((1, C), lambda b, t: (0, 0)),
            _weight_spec((C, 3 * C), lambda b, t: (0, 0)),
        ],
        out_specs=pl.BlockSpec((1, tq, 3 * C), lambda b, t: (b, t, 0)),
        compiler_params=pltpu.CompilerParams(
            dimension_semantics=("parallel", "parallel"),
            vmem_limit_bytes=vmem_limit),
        cost_estimate=cost,
    )(x, g, wqkv)


def _flash_attention(qkv, n_head, head_dim, group, tq, vmem_limit):
    """qkv: (B, T, 3C) bf16 -> y: (B, T, C) bf16, no transposes outside the kernel."""
    B, T, threeC = qkv.shape
    C = threeC // 3
    n_hg = n_head // group
    gw = group * head_dim                  # lane width per grid step (multiple of 128)
    tk = tq                                # diagonal/clamp logic assumes tq == tk
    nQ = T // tq
    kern = functools.partial(flash_attn_kernel,
                             sm_scale=1.0 / math.sqrt(head_dim),
                             n_group=group, head_dim=head_dim)
    cost = pl.CostEstimate(
        flops=int(2 * B * n_head * T * T * head_dim),          # ~causal-halved 4*
        transcendentals=int(B * n_head * T * T // 2),
        bytes_accessed=int(2 * B * T * C * 2                    # q in, y out
                           + 2 * B * T * C * (nQ + 1)))         # k,v re-reads (causal)
    return pl.pallas_call(
        kern,
        out_shape=jax.ShapeDtypeStruct((B, T, C), jnp.bfloat16),
        grid=(B, n_hg, nQ, nQ),
        in_specs=[
            # q head-group g lives at column block g of the qkv slab
            pl.BlockSpec((1, tq, gw), lambda b, g, qi, ki: (b, qi, g)),
            # k / v: clamp the k-tile index so fully-masked tiles are not re-fetched
            pl.BlockSpec((1, tk, gw),
                         lambda b, g, qi, ki: (b, jnp.minimum(ki, qi), n_hg + g)),
            pl.BlockSpec((1, tk, gw),
                         lambda b, g, qi, ki: (b, jnp.minimum(ki, qi), 2 * n_hg + g)),
        ],
        out_specs=pl.BlockSpec((1, tq, gw), lambda b, g, qi, ki: (b, qi, g)),
        scratch_shapes=[
            pltpu.VMEM((group, tq, 1), jnp.float32),        # m (running max)
            pltpu.VMEM((group, tq, 1), jnp.float32),        # l (running denom)
            pltpu.VMEM((group, tq, head_dim), jnp.float32), # acc
        ],
        compiler_params=pltpu.CompilerParams(
            dimension_semantics=("parallel", "parallel", "parallel", "arbitrary"),
            vmem_limit_bytes=vmem_limit),
        cost_estimate=cost,
    )(qkv, qkv, qkv)


def _attn_proj_mlp(x, y, wap, g2, wfc, wmp, tq, vmem_limit):
    B, T, C = x.shape
    cost = pl.CostEstimate(
        flops=int(2 * B * T * 9 * C * C),
        transcendentals=int(B * T * 4 * C),
        bytes_accessed=int(3 * 2 * B * T * C + 2 * 9 * C * C))
    # TODO(synk): for C >= ~1280 on v7x, additionally tile the 4C hidden dim of the
    # MLP with an extra 'arbitrary' grid axis + accumulator scratch to bound weights.
    return pl.pallas_call(
        attn_proj_mlp_kernel,
        out_shape=jax.ShapeDtypeStruct((B, T, C), jnp.bfloat16),
        grid=(B, T // tq),
        in_specs=[
            pl.BlockSpec((1, tq, C), lambda b, t: (b, t, 0)),     # residual x (bf16)
            pl.BlockSpec((1, tq, C), lambda b, t: (b, t, 0)),     # attn y (bf16)
            _weight_spec((C, C), lambda b, t: (0, 0)),            # attn c_proj
            _weight_spec((1, C), lambda b, t: (0, 0)),            # ln_2
            _weight_spec((C, 4 * C), lambda b, t: (0, 0)),        # mlp c_fc
            _weight_spec((4 * C, C), lambda b, t: (0, 0)),        # mlp c_proj
        ],
        out_specs=pl.BlockSpec((1, tq, C), lambda b, t: (b, t, 0)),
        compiler_params=pltpu.CompilerParams(
            dimension_semantics=("parallel", "parallel"),
            vmem_limit_bytes=vmem_limit),
        cost_estimate=cost,
    )(x, y, wap, g2, wfc, wmp)


def _lm_head(x_last, g, wlm_pad, tv, vmem_limit):
    B, C = x_last.shape
    Vp = wlm_pad.shape[1]
    cost = pl.CostEstimate(
        flops=int(2 * B * C * Vp), transcendentals=0,
        bytes_accessed=int(2 * B * C + 2 * C * Vp + 4 * B * Vp))
    return pl.pallas_call(
        lm_head_kernel,
        out_shape=jax.ShapeDtypeStruct((B, Vp), jnp.float32),
        grid=(Vp // tv,),
        in_specs=[
            _weight_spec((B, C), lambda v: (0, 0)),
            _weight_spec((1, C), lambda v: (0, 0)),
            pl.BlockSpec((C, tv), lambda v: (0, v)),
        ],
        out_specs=pl.BlockSpec((B, tv), lambda v: (0, v)),
        scratch_shapes=[pltpu.VMEM((B, C), jnp.bfloat16)],        # cached LN(x)
        compiler_params=pltpu.CompilerParams(
            # sequential so the LN scratch written at step 0 is visible to all steps
            dimension_semantics=("arbitrary",),
            vmem_limit_bytes=vmem_limit),
        cost_estimate=cost,
    )(x_last, g, wlm_pad)


# --------------------------------------------------------------------------
# GPT forward (targets=None path of the PyTorch module)
# --------------------------------------------------------------------------
def gpt_forward(idx, params, config):
    B, T = idx.shape
    C, H = config["n_embd"], config["n_head"]
    hd = C // H
    vmem_limit = _vmem_limit_bytes()
    tq = _pick_seq_tile(T, vmem_limit)

    group = _pick_head_group(H, hd)
    assert group is not None, (
        "need a head-group whose lane width (group*head_dim) is a multiple of 128; "
        "TODO(synk): add a padded/relayout path for irregular head_dim / n_head.")

    tok_emb = jnp.take(params["wte"], idx, axis=0)         # embedding gather (glue)
    pos_emb = params["wpe"][:T]
    x = (tok_emb + pos_emb).astype(jnp.bfloat16)           # drop (p=0.0) = identity

    for lp in params["blocks"]:
        qkv = _ln_qkv(x, lp["ln1"], lp["wqkv"], tq, vmem_limit)        # (B,T,3C) bf16
        y = _flash_attention(qkv, H, hd, group, tq, vmem_limit)        # (B,T,C)  bf16
        x = _attn_proj_mlp(x, y, lp["wattn_proj"], lp["ln2"],
                           lp["wfc"], lp["wmlp_proj"], tq, vmem_limit) # (B,T,C)  bf16

    V = config["vocab_size"]
    logits_p = _lm_head(x[:, -1, :], params["lnf"],
                        params["wlm_pad"], params["vocab_tile"], vmem_limit)
    logits = logits_p[:, :V][:, None, :]                   # matches x[:, [-1], :]
    loss = None                                            # targets=None branch
    return logits, loss
# TODO(synk): the targets-provided branch (full-seq logits + cross_entropy loss)
# is not exercised here; only the inference path (targets=None) is implemented.


# --------------------------------------------------------------------------
# deterministic parameter init (mirrors GPT.__init__ / _init_weights)
# --------------------------------------------------------------------------
def init_params(key, config):
    V, Bs = config["vocab_size"], config["block_size"]
    L, C = config["n_layer"], config["n_embd"]
    std = 0.02
    proj_std = 0.02 / math.sqrt(2 * L)                     # c_proj.weight override
    keys = jax.random.split(key, 2 + 4 * L)
    wte = std * jax.random.normal(keys[0], (V, C), jnp.float32)   # shared w/ lm_head
    wpe = std * jax.random.normal(keys[1], (Bs, C), jnp.float32)
    bf = jnp.bfloat16
    blocks = []
    for l in range(L):
        k0, k1, k2, k3 = keys[2 + 4 * l: 6 + 4 * l]
        blocks.append(dict(
            ln1=jnp.ones((1, C), jnp.float32),
            # torch Linear weight is (out, in); pre-transpose to (in, out), bf16
            wqkv=(std * jax.random.normal(k0, (3 * C, C), jnp.float32)).T.astype(bf),
            wattn_proj=(proj_std * jax.random.normal(k1, (C, C), jnp.float32)).T.astype(bf),
            ln2=jnp.ones((1, C), jnp.float32),
            wfc=(std * jax.random.normal(k2, (4 * C, C), jnp.float32)).T.astype(bf),
            wmlp_proj=(proj_std * jax.random.normal(k3, (C, 4 * C), jnp.float32)).T.astype(bf),
        ))
    # weight-tied lm_head, zero-padded to a lane-dense vocab tile multiple
    tv = 2048 if V >= 2048 else ((V + 127) // 128) * 128
    Vp = ((V + tv - 1) // tv) * tv
    wlm_pad = jnp.zeros((C, Vp), jnp.float32).at[:, :V].set(wte.T).astype(bf)
    return dict(wte=wte, wpe=wpe, blocks=blocks,
                lnf=jnp.ones((1, C), jnp.float32),
                wlm_pad=wlm_pad, vocab_tile=tv)


# --------------------------------------------------------------------------
# pure-JAX reference with matching bf16-matmul / f32-accumulate numerics
# --------------------------------------------------------------------------
def gpt_reference(idx, params, config):
    B, T = idx.shape
    nh, C = config["n_head"], config["n_embd"]
    hd = C // nh
    V = config["vocab_size"]
    bf, f32 = jnp.bfloat16, jnp.float32
    x = (jnp.take(params["wte"], idx, axis=0) + params["wpe"][:T]).astype(bf)
    mask = jnp.tril(jnp.ones((T, T), bool))
    for lp in params["blocks"]:
        xf = x.astype(f32)
        h = _layer_norm(xf, lp["ln1"]).astype(bf)
        qkv = jnp.einsum("btc,cd->btd", h, lp["wqkv"],
                         preferred_element_type=f32).astype(bf)
        q, k, v = jnp.split(qkv, 3, axis=-1)
        q = q.reshape(B, T, nh, hd).transpose(0, 2, 1, 3)
        k = k.reshape(B, T, nh, hd).transpose(0, 2, 1, 3)
        v = v.reshape(B, T, nh, hd).transpose(0, 2, 1, 3)
        att = jnp.einsum("bhqd,bhkd->bhqk", q, k,
                         preferred_element_type=f32) / math.sqrt(hd)
        att = jnp.where(mask, att, -jnp.inf)
        att = jax.nn.softmax(att, axis=-1)
        y = jnp.einsum("bhqk,bhkd->bhqd", att.astype(bf), v,
                       preferred_element_type=f32)
        y = y.astype(bf).transpose(0, 2, 1, 3).reshape(B, T, C)
        xf = xf + jnp.einsum("btc,cd->btd", y, lp["wattn_proj"],
                             preferred_element_type=f32)
        h2 = _layer_norm(xf, lp["ln2"]).astype(bf)
        fc = jnp.einsum("btc,cd->btd", h2, lp["wfc"], preferred_element_type=f32)
        fc = _gelu_exact(fc).astype(bf)
        xf = xf + jnp.einsum("btc,cd->btd", fc, lp["wmlp_proj"],
                             preferred_element_type=f32)
        x = xf.astype(bf)                                   # bf16 residual carry
    xl = _layer_norm(x[:, -1, :].astype(f32), params["lnf"]).astype(bf)
    logits = jnp.dot(xl, params["wlm_pad"], preferred_element_type=f32)[:, :V]
    return logits[:, None, :]


if __name__ == "__main__":
    # small demo config: C=128 keeps every lane-block a multiple of 128
    config = dict(vocab_size=128, block_size=32, n_layer=2,
                  n_head=4, n_embd=128, dropout=0.0)
    key = jax.random.PRNGKey(0)
    pkey, ikey = jax.random.split(key)
    params = init_params(pkey, config)

    B, T = 2, 16
    idx = jax.random.randint(ikey, (B, T), 0, config["vocab_size"], dtype=jnp.int32)

    logits, loss = gpt_forward(idx, params, config)
    logits = jax.block_until_ready(logits)
    assert logits.shape == (B, 1, config["vocab_size"]) and loss is None

    ref = np.asarray(gpt_reference(idx, params, config), dtype=np.float32)
    np.testing.assert_allclose(np.asarray(logits, dtype=np.float32), ref,
                               atol=2e-2, rtol=2e-2)
    print("KERNEL_OK")
</pallas_src>

<mosaic_0001>
module attributes {stable_mosaic.version = 11 : i64} {
  func.func @_k(%arg0: i32, %arg1: memref<8x128xf32, #tpu.memory_space<vmem>>, %arg2: memref<8x128xf32, #tpu.memory_space<vmem>>, %arg3: memref<8x128xf32, #tpu.memory_space<vmem>>) attributes {dimension_semantics = [#tpu.dimension_semantics<arbitrary>], iteration_bounds = array<i64: 2>, scalar_prefetch = 0 : i64, scratch_operands = 0 : i64, tpu.core_type = #tpu.core_type<tc>, window_params = [{transform_indices = @transform_0, window_bounds = array<i64: 8, 128>}, {pipeline_mode = #tpu.pipeline_mode<synchronous>, transform_indices = @transform_1, window_bounds = array<i64: 8, 128>}, {transform_indices = @transform_2, window_bounds = array<i64: 8, 128>}]} {
    %c0 = arith.constant 0 : index
    %c0_0 = arith.constant 0 : index
    %0 = vector.load %arg1[%c0, %c0_0] : memref<8x128xf32, #tpu.memory_space<vmem>>, vector<8x128xf32>
    %c0_1 = arith.constant 0 : index
    %c0_2 = arith.constant 0 : index
    %1 = vector.load %arg2[%c0_1, %c0_2] : memref<8x128xf32, #tpu.memory_space<vmem>>, vector<8x128xf32>
    %2 = arith.addf %0, %1 : vector<8x128xf32>
    %c0_3 = arith.constant 0 : index
    %c0_4 = arith.constant 0 : index
    %3 = vector.load %arg3[%c0_3, %c0_4] : memref<8x128xf32, #tpu.memory_space<vmem>>, vector<8x128xf32>
    tpu.vector_store %arg3[%c0_3, %c0_4], %2 {strides = array<i32>} : memref<8x128xf32, #tpu.memory_space<vmem>>, vector<8x128xf32>,
    return
  }
  func.func @transform_0(%arg0: i32) -> (i32, i32) {
    %c0_i32 = arith.constant 0 : i32
    %c0_i32_0 = arith.constant 0 : i32
    return %arg0, %c0_i32 : i32, i32
  }
  func.func @transform_1(%arg0: i32) -> (i32, i32) {
    %c0_i32 = arith.constant 0 : i32
    %c0_i32_0 = arith.constant 0 : i32
    %c0_i32_1 = arith.constant 0 : i32
    return %c0_i32, %c0_i32_0 : i32, i32
  }
  func.func @transform_2(%arg0: i32) -> (i32, i32) {
    %c0_i32 = arith.constant 0 : i32
    %c0_i32_0 = arith.constant 0 : i32
    return %arg0, %c0_i32 : i32, i32
  }
}

module attributes {stable_mosaic.version = 11 : i64} {
  func.func @ln_qkv_kernel(%arg0: i32, %arg1: i32, %arg2: memref<1x16x128xbf16, #tpu.memory_space<vmem>>, %arg3: memref<1x128xf32, #tpu.memory_space<vmem>>, %arg4: memref<128x384xbf16, #tpu.memory_space<vmem>>, %arg5: memref<1x16x384xbf16, #tpu.memory_space<vmem>>) attributes {dimension_semantics = [#tpu.dimension_semantics<parallel>, #tpu.dimension_semantics<parallel>], iteration_bounds = array<i64: 2, 1>, scalar_prefetch = 0 : i64, scratch_operands = 0 : i64, tpu.core_type = #tpu.core_type<tc>, window_params = [{transform_indices = @transform_0, window_bounds = array<i64: 1, 16, 128>}, {pipeline_mode = #tpu.pipeline_mode<synchronous>, transform_indices = @transform_1, window_bounds = array<i64: 1, 128>}, {pipeline_mode = #tpu.pipeline_mode<synchronous>, transform_indices = @transform_2, window_bounds = array<i64: 128, 384>}, {transform_indices = @transform_3, window_bounds = array<i64: 1, 16, 384>}]} {
    %c0 = arith.constant 0 : index
    %c0_0 = arith.constant 0 : index
    %c0_1 = arith.constant 0 : index
    %0 = vector.load %arg2[%c0, %c0_0, %c0_1] : memref<1x16x128xbf16, #tpu.memory_space<vmem>>, vector<1x16x128xbf16>
    %1 = vector.shape_cast %0 : vector<1x16x128xbf16> to vector<16x128xbf16>
    %2 = arith.extf %1 : vector<16x128xbf16> to vector<16x128xf32>
    %c0_2 = arith.constant 0 : index
    %c0_3 = arith.constant 0 : index
    %3 = vector.load %arg3[%c0_2, %c0_3] : memref<1x128xf32, #tpu.memory_space<vmem>>, vector<1x128xf32>
    %cst = arith.constant dense<0.000000e+00> : vector<16xf32>
    %4 = vector.multi_reduction <add>, %2, %cst [1] : vector<16x128xf32> to vector<16xf32>
    %5 = vector.shape_cast %4 : vector<16xf32> to vector<16x1xf32>
    %cst_4 = arith.constant 1.280000e+02 : f32
    %6 = vector.broadcast %cst_4 : f32 to vector<16x1xf32>
    %7 = arith.divf %5, %6 : vector<16x1xf32>
    %8 = vector.broadcast %7 : vector<16x1xf32> to vector<16x128xf32>
    %9 = arith.subf %2, %8 : vector<16x128xf32>
    %10 = arith.mulf %9, %9 : vector<16x128xf32>
    %cst_5 = arith.constant dense<0.000000e+00> : vector<16xf32>
    %11 = vector.multi_reduction <add>, %10, %cst_5 [1] : vector<16x128xf32> to vector<16xf32>
    %12 = vector.shape_cast %11 : vector<16xf32> to vector<16x1xf32>
    %cst_6 = arith.constant 1.280000e+02 : f32
    %13 = vector.broadcast %cst_6 : f32 to vector<16x1xf32>
    %14 = arith.divf %12, %13 : vector<16x1xf32>
    %cst_7 = arith.constant 9.99999974E-6 : f32
    %15 = vector.broadcast %cst_7 : f32 to vector<16x1xf32>
    %16 = arith.addf %14, %15 : vector<16x1xf32>
    %17 = math.rsqrt %16 : vector<16x1xf32>
    %18 = vector.broadcast %17 : vector<16x1xf32> to vector<16x128xf32>
    %19 = arith.mulf %9, %18 : vector<16x128xf32>
    %20 = vector.broadcast %3 : vector<1x128xf32> to vector<16x128xf32>
    %21 = arith.mulf %19, %20 : vector<16x128xf32>
    %22 = arith.truncf %21 : vector<16x128xf32> to vector<16x128xbf16>
    %c0_8 = arith.constant 0 : index
    %c0_9 = arith.constant 0 : index
    %23 = vector.load %arg4[%c0_8, %c0_9] : memref<128x384xbf16, #tpu.memory_space<vmem>>, vector<128x384xbf16>
    %cst_10 = arith.constant dense<0.000000e+00> : vector<16x384xf32>
    %24 = tpu.matmul %22, %23, %cst_10 {dimension_numbers = #tpu.dot_dimension_numbers<[1], [0], [0], [1], [0, 0, 1, 1], [], []>} : vector<16x128xbf16>, vector<128x384xbf16>, vector<16x384xf32> -> vector<16x384xf32>
    %25 = arith.truncf %24 : vector<16x384xf32> to vector<16x384xbf16>
    %c0_11 = arith.constant 0 : index
    %c0_12 = arith.constant 0 : index
    %c0_13 = arith.constant 0 : index
    %26 = vector.load %arg5[%c0_11, %c0_12, %c0_13] : memref<1x16x384xbf16, #tpu.memory_space<vmem>>, vector<1x16x384xbf16>
    %27 = vector.shape_cast %26 : vector<1x16x384xbf16> to vector<16x384xbf16>
    %28 = vector.shape_cast %25 : vector<16x384xbf16> to vector<1x16x384xbf16>
    tpu.vector_store %arg5[%c0_11, %c0_12, %c0_13], %28 {strides = array<i32>} : memref<1x16x384xbf16, #tpu.memory_space<vmem>>, vector<1x16x384xbf16>,
    return
  }
  func.func @transform_0(%arg0: i32, %arg1: i32) -> (i32, i32, i32) {
    %c0_i32 = arith.constant 0 : i32
    %c0_i32_0 = arith.constant 0 : i32
    return %arg0, %arg1, %c0_i32 : i32, i32, i32
  }
  func.func @transform_1(%arg0: i32, %arg1: i32) -> (i32, i32) {
    %c0_i32 = arith.constant 0 : i32
    %c0_i32_0 = arith.constant 0 : i32
    %c0_i32_1 = arith.constant 0 : i32
    return %c0_i32, %c0_i32_0 : i32, i32
  }
  func.func @transform_2(%arg0: i32, %arg1: i32) -> (i32, i32) {
    %c0_i32 = arith.constant 0 : i32
    %c0_i32_0 = arith.constant 0 : i32
    %c0_i32_1 = arith.constant 0 : i32
    return %c0_i32, %c0_i32_0 : i32, i32
  }
  func.func @transform_3(%arg0: i32, %arg1: i32) -> (i32, i32, i32) {
    %c0_i32 = arith.constant 0 : i32
    %c0_i32_0 = arith.constant 0 : i32
    return %arg0, %arg1, %c0_i32 : i32, i32, i32
  }
}

</mosaic_0001>

<bundles_post_ra>
// kernel: tpu_custom_call.1
= control target key start
LH: loop header
LB: loop body
LE: loop exit
PB: predicated region body
PF: predicated region fallthrough
CT: control target
= control target key end

     0   :  { %7 = vsyncpa [#allocation3], 0  ;;  %s690_s0 = inlined_call_operand.hbm [shape: f32[16,128], index: 0, kind: input, shape index: {}]   ;;  %s691_s1 = inlined_call_operand.hbm [shape: f32[8,128], index: 1, kind: input, shape index: {}]   ;;  %s692_s2 = inlined_call_operand.hbm [shape: f32[16,128], index: 2, kind: output, shape index: {}]  }
   0x1   :  { %9 = vsyncpa [#allocation3 + $0x1], 0 }
   0x2   :  { %10 = vsyncpa [#allocation6], 0 }
   0x3   :  { %11 = vsyncpa [#allocation4], 0 }
   0x4   :  { %13 = vsyncpa [#allocation4 + $0x1], 0  ;;  %s489_s9 = smov 0   ;;  %s491_s10 = smov 0  }
   0x5   :  { %s493_s11 = smov 0   ;;  %s495_s12 = smov 0  }
   0x6 LB: > { %s510_s13 = sadd.s32 4294967295, %s469_s12   ;;  %s270_s14 = sadd.s32 4294967294, %s469_s12   ;;  %s469_s12 = sphi %s495_s12, %s716_s12   ;;  %s465_s11 = sphi %s493_s11, %s715_s11   ;;  %s461_s10 = sphi %s491_s10, %s714_s10   ;;  %s457_s9 = sphi %s489_s9, %s713_s9  }
   0x7   : > { %p39_p0 = scmp.ne.s32.totalorder %s461_s10, %s457_s9  ;;  %p693_p1 = scmp.eq.s32.totalorder %s510_s13, 0 }
   0x8   : > { %p90_p3 = scmp.eq.s32.totalorder %s270_s14, 1  ;;  %p271_p5 = scmp.ge.s32.totalorder %s469_s12, 1 }
   0x9   : > { %p519_p4 = por %p693_p1, %p39_p0  ;;  %p97_p7 = scmp.lt.s32.totalorder %s469_s12, 3 }
   0xa   : > { %p524_p6 = por %p90_p3, %p39_p0  ;;  %s471_s18 = smov [#allocation5]  }
   0xb   : > { %s696_s15 = scalar_select %p519_p4, 1, 0 }
   0xc   : > { %s697_s16 = scalar_select %p524_p6, 1, 0 }
   0xd   : > { %p529_p8 = pnand %p271_p5, %p97_p7  ;;  %s110_s19 = sshll.u32 %s471_s18, 4  ;;  %s111_s19 = int_to_ptr.vmem [resolvable:$true] %s110_s19 }
   0xe   : > { %s537_s20 = sadd.s32 1, %s469_s12   ;;  %s26_s24 = sadd.s32 1, %s465_s11 }
   0xf   : > { %s698_s17 = scalar_select %p529_p8, 1, 0 }
  0x10   : > { %p292_p10 = pneg %p529_p8  ;;  %s23_s22 = ssub.s32 %s469_s12, %s537_s20 }
  0x11   : > { %p547_p12 = scmp.eq.s32.totalorder %s23_s22, 0  ;;  %s341_s27 = scalar_lea.hbm %s691_s1, 128 }
  0x12   : > { %p541_p11 = pnand %p292_p10, %p693_p1  ;;  %p342_p0 = scmp.ne.s32.totalorder %s691_s1, %s341_s27 }
  0x13   : > { %s700_s23 = scalar_select %p547_p12, 1, 0 }
  0x14   : > { %p343_p3 = pneg %p541_p11  ;;  %p348_p10 = scmp.lt.u32.totalorder %s341_s27, %s691_s1 }
  0x16   : > { %p344_p5 = pnand %p343_p3, %p342_p0 }
  0x18   : > { %p345_p7 = pneg %p344_p5 }
  0x1a   : > { %p350_p9 = pnand %p348_p10, %p345_p7 }
  0x1c   : > { %353 = shalt.err (!%p350_p9)
}
  0x1d   : > { %s354_s4 = scalar_lea.vmem %s111_s19, 128  ;;  %p362_p6 = scmp.lt.s32.totalorder %s111_s19, %s111_s19 }
  0x1e   : > { %p355_p1 = scmp.ne.s32.totalorder %s111_s19, %s354_s4  ;;  %p363_p4 = scmp.lt.s32.totalorder %s354_s4, %s354_s4 }
  0x20   : > { %p357_p2 = pnand %p355_p1, %p343_p3  ;;  %p364_p8 = por %p363_p4, %p362_p6 }
  0x22   : > { %p358_p13 = pneg %p357_p2 }
  0x24   : > { %p365_p12 = pnand %p364_p8, %p358_p13 }
  0x26   : > { %368 = shalt.err (!%p365_p12)
}
  0x27   : > { %295 = dma.hbm_to_vmem [thread:$0]  (!%p541_p11), %s691_s1, 128, %s111_s19, [#allocation6]  }
  0x28   : > { %p701_p1 = scmp.ne.s32.totalorder %s700_s23, 0  ;;  %p34_p2 = scmp.eq.s32.totalorder %s469_s12, 0 }
  0x29   : > { %p702_p4 = scmp.ne.s32.totalorder %s465_s11, %s461_s10  ;;  %p703_p6 = scmp.eq.s32.totalorder %s510_s13, 1 }
  0x2a   : > { %s573_s7 = scalar_select %p701_p1, %s465_s11, %s26_s24  }
  0x2b   : > { %p581_p8 = por %p703_p6, %p702_p4  ;;  %p305_p9 = scmp.lt.s32.totalorder %s469_s12, 2 }
  0x2c   : > { %s121_s14 = sand.u32 1, %s465_s11   ;;  %p705_p12 = pmov %p702_p4 }
  0x2d   : > { %s274_s18 = sshll.u32 %s121_s14, 3  ;;  %s275_s21 = sshll.u32 %s469_s12, 7 }
  0x2e   : > { %p35_p13 = por %p34_p2, %p705_p12  ;;  %s594_s19 = scalar_lea.hbm %s690_s0, %s275_s21 }
  0x2f   : > { %s125_s23 = scalar_lea.vmem [#allocation2], %s274_s18  ;;  %s122_s27 = scalar_lea.sflag [#allocation3], %s121_s14 }
  0x30   : > { %s132_s24 = sshll.u32 %s125_s23, 4  ;;  %p596_p11 = pnand %p305_p9, %p35_p13  ;;  %s600_s24 = int_to_ptr.vmem [resolvable:$true] %s132_s24 }
  0x31   : > { %s369_s28 = scalar_lea.hbm %s594_s19, 128  ;;  %s374_s3 = scalar_lea.hbm %s690_s0, 256 }
  0x32   : > { %p370_p0 = scmp.ne.s32.totalorder %s594_s19, %s369_s28  ;;  %p371_p3 = pneg %p596_p11 }
  0x33   : > { %p375_p10 = scmp.lt.u32.totalorder %s594_s19, %s690_s0  ;;  %p376_p1 = scmp.lt.u32.totalorder %s374_s3, %s369_s28 }
  0x34   : > { %p372_p5 = pnand %p371_p3, %p370_p0  ;;  %p378_p4 = scmp.lt.u32.totalorder %s369_s28, %s594_s19 }
  0x35   : > { %p377_p2 = por %p376_p1, %p375_p10 }
  0x36   : > { %p373_p7 = pneg %p372_p5 }
  0x37   : > { %p379_p6 = por %p378_p4, %p377_p2 }
  0x39   : > { %p380_p9 = pnand %p379_p6, %p373_p7 }
  0x3b   : > { %383 = shalt.err (!%p380_p9)
}
  0x3c   : > { %s384_s6 = scalar_lea.vmem %s600_s24, 128  ;;  %s472_s14 = smov [#allocation2]  }
  0x3d   : > { %p385_p12 = scmp.ne.s32.totalorder %s600_s24, %s384_s6  ;;  %s389_s18 = sshll.u32 %s472_s14, 4  ;;  %s390_s18 = int_to_ptr.vmem [resolvable:$false] %s389_s18 }
  0x3e   : > { %s391_s21 = scalar_lea.vmem %s390_s18, 256  ;;  %p392_p5 = scmp.lt.s32.totalorder %s600_s24, %s390_s18 }
  0x3f   : > { %p387_p13 = pnand %p385_p12, %p371_p3  ;;  %p393_p10 = scmp.lt.s32.totalorder %s391_s21, %s384_s6 }
  0x41   : > { %p388_p0 = pneg %p387_p13  ;;  %p394_p1 = por %p393_p10, %p392_p5 }
  0x43   : > { %p395_p2 = pnand %p394_p1, %p388_p0 }
  0x45   : > { %398 = shalt.err (!%p395_p2)
}
  0x46   : > { %299 = dma.hbm_to_vmem [thread:$0]  (!%p596_p11), %s594_s19, 128, %s600_s24, %s122_s27  }
  0x47   : > { %p707_p7 = scmp.ne.s32.totalorder %s698_s17, 0 }
  0x48   : > { %s630_s22 = sand.u32 (!%p707_p7), 1, %s461_s10   ;;  %p708_p3 = scmp.ne.s32.totalorder (!%p707_p7), %s696_s15, 0 }
  0x49   : > { %141 = sbr.rel (%p707_p7) target bundleno = 109 (0x6d), region = 28  ;;  %s277_s25 = sshll.u32 (!%p707_p7), %s630_s22, 3 }
  0x4a   : > { %s144_s23 = scalar_lea.sflag (!%p707_p7), [#allocation3], %s630_s22  ;;  %s147_s28 = scalar_lea.vmem (!%p707_p7), [#allocation2], %s277_s25 }
  0x50   : > { %444 = dma.done.wait (%p708_p3), %s144_s23, 128  }
  0x51   : > { %446 = vsyncadd (%p708_p3), %s144_s23, 4294967168  ;;  %p709_p4 = scmp.eq.s32.totalorder %s510_s13, 0 }
  0x53   : > { %448 = dma.done.wait (%p709_p4), [#allocation6], 128   ;;  %p710_p11 = pmov %p709_p4 }
  0x54   : > { %s171_s17 = scalar_lea.vmem [#allocation7], %s277_s25  ;;  %s281_s24 = sshll.u32 %s510_s13, 7  ;;  %v172_v0 = vld [vmem:[%s147_s28] sm:$0xff]  ;;  %v173_v1 = vld [vmem:[#allocation5] sm:$0xff] }
  0x55   : > { %450 = vsyncadd (%p710_p11), [#allocation6], 4294967168  ;;  %s190_s19 = sshll.u32 %s171_s17, 4  ;;  %v174_v2 = vadd.f32 %v173_v1, %v172_v0  ;;  %s648_s27 = scalar_lea.hbm %s692_s2, %s281_s24  ;;  %s643_s19 = int_to_ptr.vmem [resolvable:$true] %s190_s19 }
  0x56   : > { %s177_s29 = scalar_lea.sflag [#allocation4], %s630_s22  ;;  %s399_s30 = scalar_lea.vmem %s643_s19, 128 }
  0x57   : > { %175 = vst [vmem:[%s171_s17] sm:$0xff] %v174_v2  ;;  %p400_p6 = scmp.ne.s32.totalorder %s643_s19, %s399_s30  ;;  %s473_s13 = smov [#allocation7]  }
  0x58   : > { %s403_s3 = sshll.u32 %s473_s13, 4  ;;  %s404_s3 = int_to_ptr.vmem [resolvable:$false] %s403_s3 }
  0x59   : > { %p401_p9 = pnand %p400_p6, %p581_p8  ;;  %s405_s4 = scalar_lea.vmem %s404_s3, 256 }
  0x5a   : > { %p406_p13 = scmp.lt.s32.totalorder %s643_s19, %s404_s3  ;;  %p407_p0 = scmp.lt.s32.totalorder %s405_s4, %s399_s30 }
  0x5b   : > { %p402_p12 = pneg %p401_p9 }
  0x5c   : > { %p408_p5 = por %p407_p0, %p406_p13 }
  0x5e   : > { %p409_p10 = pnand %p408_p5, %p402_p12 }
  0x60   : > { %412 = shalt.err (!%p409_p10)
}
  0x61   : > { %s413_s5 = scalar_lea.hbm %s648_s27, 128  ;;  %s417_s18 = scalar_lea.hbm %s692_s2, 256 }
  0x62   : > { %p414_p1 = scmp.ne.s32.totalorder %s648_s27, %s413_s5  ;;  %p418_p3 = scmp.lt.u32.totalorder %s648_s27, %s692_s2 }
  0x63   : > { %p419_p4 = scmp.lt.u32.totalorder %s417_s18, %s413_s5  ;;  %p421_p6 = scmp.lt.u32.totalorder %s413_s5, %s648_s27 }
  0x64   : > { %p415_p2 = pnand %p414_p1, %p581_p8 }
  0x65   : > { %p420_p11 = por %p419_p4, %p418_p3 }
  0x66   : > { %p416_p7 = pneg %p415_p2 }
  0x67   : > { %p422_p9 = por %p421_p6, %p420_p11 }
  0x69   : > { %p423_p12 = pnand %p422_p9, %p416_p7 }
  0x6b   : > { %426 = shalt.err (!%p423_p12)
}
  0x6c   : > { %290 = dma.vmem_to_hbm [thread:$0]  (%p581_p8), %s643_s19, 128, %s648_s27, %s177_s29  }
  0x6d PF: > { %s202_s25 = sand.u32 1, %s457_s9   ;;  %p711_p13 = scmp.ne.s32.totalorder %s697_s16, 0 }
  0x6e   : > { %p712_p0 = scmp.ge.s32.totalorder %s469_s12, 2  ;;  %s203_s23 = scalar_lea.sflag [#allocation4], %s202_s25 }
  0x70   : > { %p301_p5 = pnand %p712_p0, %p711_p13 }
  0x72   : > { %452 = dma.done.wait (!%p301_p5), %s203_s23, 128  }
  0x73   : > { %454 = vsyncadd (!%p301_p5), %s203_s23, 4294967168  ;;  %p16_p10 = scmp.ge.s32.totalorder %s537_s20, 4   ;;  %s713_s9 = smov %s461_s10 }
  0x74   : > { %s714_s10 = smov %s465_s11  ;;  %s715_s11 = smov %s573_s7 }
  0x75   : > { %s716_s12 = smov %s537_s20  ;;  %18 = sbr.rel (!%p16_p10) target bundleno = 6 (0x6), region = 77 }
  0x7c   :  { %208 = vsyncpa [#allocation3], 1 }
  0x7d   :  { %210 = vsyncpa [#allocation3 + $0x1], 1 }
  0x7e   :  { %211 = vsyncpa [#allocation6], 1 }
  0x7f   :  { %212 = vsyncpa [#allocation4], 1 }
  0x80   :  { %214 = vsyncpa [#allocation4 + $0x1], 1 }

// kernel: tpu_custom_call.1
= control target key start
LH: loop header
LB: loop body
LE: loop exit
PB: predicated region body
PF: predicated region fallthrough
CT: control target
= control target key end

     0   :  { %8 = vsyncpa [#allocation3], 0  ;;  %s1349_s0 = inlined_call_operand.hbm [shape: bf16[2,16,128], index: 0, kind: input, shape index: {}]   ;;  %s1350_s1 = inlined_call_operand.hbm [shape: f32[1,128], index: 1, kind: input, shape index: {}]   ;;  %s1351_s2 = inlined_call_operand.hbm [shape: bf16[128,384], index: 2, kind: input, shape index: {}]   ;;  %s1352_s3 = inlined_call_operand.hbm [shape: bf16[2,16,384], index: 3, kind: output, shape index: {}]  }
   0x1   :  { %10 = vsyncpa [#allocation3 + $0x1], 0 }
   0x2   :  { %11 = vsyncpa [#allocation6], 0 }
   0x3   :  { %12 = vsyncpa [#allocation4], 0 }
   0x4   :  { %14 = vsyncpa [#allocation4 + $0x1], 0  ;;  %s1085_s12 = smov 0   ;;  %s1087_s13 = smov 0  }
   0x5   :  { %s1089_s14 = smov 0   ;;  %s1091_s15 = smov 0  }
   0x6   :  { %s1093_s16 = smov 0   ;;  %s1095_s17 = smov 0  }
   0x7 LB: > { %s665_s18 = sadd.s32 4294967295, %s1050_s17   ;;  %s666_s19 = sadd.s32 4294967294, %s1050_s17   ;;  %s1050_s17 = sphi %s1095_s17, %s20_s17   ;;  %s1046_s16 = sphi %s1093_s16, %s1379_s16   ;;  %s1042_s15 = sphi %s1091_s15, %s1378_s15   ;;  %s1038_s14 = sphi %s1089_s14, %s1377_s14   ;;  %s1034_s13 = sphi %s1087_s13, %s1376_s13   ;;  %s1030_s12 = sphi %s1085_s12, %s1375_s12  }
   0x8   : > { %s41_s20 = sadd.s32 1, %s1038_s14  ;;  %p48_p0 = scmp.ne.s32.totalorder %s1038_s14, %s1034_s13 }
   0x9   : > { %p49_p1 = scmp.eq.s32.totalorder %s1050_s17, 0  ;;  %p54_p2 = scmp.ne.s32.totalorder %s1034_s13, %s1030_s12 }
   0xa   : > { %p1123_p3 = scmp.eq.s32.totalorder %s665_s18, 0  ;;  %p122_p4 = scmp.eq.s32.totalorder %s665_s18, 1 }
   0xb   : > { %p1127_p5 = por %p49_p1, %p48_p0  ;;  %p128_p6 = scmp.eq.s32.totalorder %s666_s19, 1 }
   0xc   : > { %s1359_s21 = scalar_select %p1123_p3, 1, 0 }
   0xd   : > { %p1133_p7 = por %p1123_p3, %p54_p2  ;;  %p1137_p8 = por %p122_p4, %p48_p0 }
   0xe   : > { %p1141_p9 = por %p128_p6, %p54_p2  ;;  %p667_p10 = scmp.ge.s32.totalorder %s1050_s17, 1 }
   0xf   : > { %s1361_s23 = scalar_select %p1133_p7, 1, 0 }
  0x10   : > { %s1362_s24 = scalar_select %p1137_p8, 1, 0 }
  0x11   : > { %s1363_s25 = scalar_select %p1141_p9, 1, 0 }
  0x12   : > { %p135_p11 = scmp.lt.s32.totalorder %s1050_s17, 3  ;;  %s1052_s27 = smov [#allocation5]  }
  0x13   : > { %s148_s28 = sshll.u32 %s1052_s27, 4  ;;  %p779_p1 = scmp.lt.s32.totalorder %s1050_s17, 2  ;;  %s149_s28 = int_to_ptr.vmem [resolvable:$true] %s148_s28 }
  0x14   : > { %p1148_p13 = pnand %p667_p10, %p135_p11  ;;  %s1053_s30 = smov [#allocation7]  }
  0x15   : > { %p1157_p4 = pnand %p779_p1, %p1127_p5  ;;  %s158_s4 = sshll.u32 %s1053_s30, 4  ;;  %s1167_s4 = int_to_ptr.vmem [resolvable:$true] %s158_s4 }
  0x16   : > { %s1364_s26 = scalar_select %p1148_p13, 1, 0 }
  0x17   : > { %p762_p0 = pneg %p1148_p13  ;;  %s878_s8 = scalar_lea.hbm %s1350_s1, 16 }
  0x18   : > { %s1365_s29 = scalar_select %p1157_p4, 1, 0 }
  0x19   : > { %p1163_p2 = pnand %p762_p0, %p1123_p3  ;;  %p879_p5 = scmp.ne.s32.totalorder %s1350_s1, %s878_s8 }
  0x1a   : > { %p885_p1 = scmp.lt.u32.totalorder %s878_s8, %s1350_s1 }
  0x1b   : > { %p880_p6 = pneg %p1163_p2 }
  0x1d   : > { %p881_p10 = pnand %p880_p6, %p879_p5 }
  0x1f   : > { %p882_p11 = pneg %p881_p10 }
  0x21   : > { %p887_p0 = pnand %p885_p1, %p882_p11 }
  0x23   : > { %890 = shalt.err (!%p887_p0)
}
  0x24   : > { %s891_s19 = scalar_lea.vmem %s149_s28, 16  ;;  %s898_s22 = scalar_lea.vmem %s149_s28, 32 }
  0x25   : > { %p892_p12 = scmp.ne.s32.totalorder %s149_s28, %s891_s19  ;;  %p899_p3 = scmp.lt.s32.totalorder %s149_s28, %s149_s28 }
  0x26   : > { %p900_p7 = scmp.lt.s32.totalorder %s898_s22, %s891_s19 }
  0x27   : > { %p894_p9 = pnand %p892_p12, %p880_p6 }
  0x28   : > { %p901_p13 = por %p900_p7, %p899_p3 }
  0x29   : > { %p895_p8 = pneg %p894_p9 }
  0x2b   : > { %p902_p4 = pnand %p901_p13, %p895_p8 }
  0x2d   : > { %905 = shalt.err (!%p902_p4)
}
  0x2e   : > { %765 = dma.hbm_to_vmem [thread:$0]  (!%p1163_p2), %s1350_s1, 16, %s149_s28, [#allocation6]  }
  0x2f   : > { %s906_s8 = scalar_lea.hbm %s1351_s2, 3072 }
  0x30   : > { %p907_p9 = scmp.ne.s32.totalorder %s1351_s2, %s906_s8  ;;  %p913_p8 = scmp.lt.u32.totalorder %s906_s8, %s1351_s2 }
  0x32   : > { %p909_p3 = pnand %p907_p9, %p880_p6 }
  0x34   : > { %p910_p7 = pneg %p909_p3 }
  0x36   : > { %p915_p12 = pnand %p913_p8, %p910_p7 }
  0x38   : > { %918 = shalt.err (!%p915_p12)
}
  0x39   : > { %s919_s28 = scalar_lea.vmem %s1167_s4, 3072  ;;  %p927_p10 = scmp.lt.s32.totalorder %s1167_s4, %s1167_s4 }
  0x3a   : > { %p920_p13 = scmp.ne.s32.totalorder %s1167_s4, %s919_s28  ;;  %p928_p11 = scmp.lt.s32.totalorder %s919_s28, %s919_s28 }
  0x3c   : > { %p922_p4 = pnand %p920_p13, %p880_p6  ;;  %p929_p1 = por %p928_p11, %p927_p10 }
  0x3e   : > { %p923_p5 = pneg %p922_p4 }
  0x40   : > { %p930_p0 = pnand %p929_p1, %p923_p5 }
  0x42   : > { %933 = shalt.err (!%p930_p0)
}
  0x43   : > { %s1054_s19 = smov 192   ;;  %s1055_s22 = smov 12  }
  0x44   : > { %768 = dma.hbm_to_vmem [thread:$0]  (!%p1163_p2), %s1351_s2, 3072, %s1167_s4, [#allocation6], %s1054_s19, %s1054_s19, %s1055_s22  }
  0x45   : > { %s172_s6 = sand.u32 1, %s1038_s14   ;;  %s32_s7 = sadd.s32 1, %s1046_s16 }
  0x46   : > { %s671_s8 = sshll.u32 %s172_s6, 3  ;;  %p34_p6 = scmp.ge.s32.totalorder %s32_s7, 2 }
  0x47   : > { %s710_s9 = sshll.u32 %s1046_s16, 7  ;;  %s176_s10 = scalar_lea.vmem [#allocation2], %s671_s8 }
  0x48   : > { %s185_s11 = sshll.u32 %s176_s10, 4  ;;  %s1381_s7 = smov (%p34_p6, %s32_s7), 0  ;;  %s1226_s11 = int_to_ptr.vmem [resolvable:$true] %s185_s11 }
  0x49   : > { %s1224_s5 = scalar_lea.hbm %s1349_s0, %s710_s9  ;;  %s36_s4 = ssub.s32 %s1046_s16, %s1381_s7 }
  0x4a   : > { %p1230_p2 = scmp.eq.s32.totalorder %s36_s4, 0  ;;  %s1234_s22 = scalar_lea.sflag [#allocation3], %s172_s6 }
  0x4b   : > { %s934_s27 = scalar_lea.hbm %s1224_s5, 128  ;;  %p1368_p3 = scmp.ne.s32.totalorder %s1365_s29, 0 }
  0x4c   : > { %p935_p9 = scmp.ne.s32.totalorder %s1224_s5, %s934_s27  ;;  %s939_s9 = scalar_lea.hbm %s1349_s0, 256 }
  0x4d   : > { %p936_p7 = pneg %p1368_p3  ;;  %p940_p13 = scmp.lt.u32.totalorder %s1224_s5, %s1349_s0 }
  0x4e   : > { %p941_p4 = scmp.lt.u32.totalorder %s939_s9, %s934_s27  ;;  %p943_p10 = scmp.lt.u32.totalorder %s934_s27, %s1224_s5 }
  0x4f   : > { %p937_p8 = pnand %p936_p7, %p935_p9 }
  0x50   : > { %p942_p5 = por %p941_p4, %p940_p13 }
  0x51   : > { %p938_p12 = pneg %p937_p8 }
  0x52   : > { %p944_p11 = por %p943_p10, %p942_p5 }
  0x54   : > { %p945_p1 = pnand %p944_p11, %p938_p12 }
  0x56   : > { %948 = shalt.err (!%p945_p1)
}
  0x57   : > { %s949_s6 = scalar_lea.vmem %s1226_s11, 128  ;;  %s1056_s28 = smov [#allocation2]  }
  0x58   : > { %p950_p0 = scmp.ne.s32.totalorder %s1226_s11, %s949_s6  ;;  %s954_s4 = sshll.u32 %s1056_s28, 4  ;;  %s955_s4 = int_to_ptr.vmem [resolvable:$false] %s954_s4 }
  0x59   : > { %s956_s30 = scalar_lea.vmem %s955_s4, 256  ;;  %p957_p8 = scmp.lt.s32.totalorder %s1226_s11, %s955_s4 }
  0x5a   : > { %p952_p6 = pnand %p950_p0, %p936_p7  ;;  %p958_p13 = scmp.lt.s32.totalorder %s956_s30, %s949_s6 }
  0x5c   : > { %p953_p9 = pneg %p952_p6  ;;  %p959_p4 = por %p958_p13, %p957_p8 }
  0x5e   : > { %p960_p5 = pnand %p959_p4, %p953_p9 }
  0x60   : > { %963 = shalt.err (!%p960_p5)
}
  0x61   : > { %s1057_s27 = smov 64   ;;  %s1058_s8 = smov 4  }
  0x62   : > { %772 = dma.hbm_to_vmem [thread:$0]  (!%p1368_p3), %s1224_s5, 128, %s1226_s11, %s1234_s22, %s1057_s27, %s1057_s27, %s1058_s8  }
  0x63   : > { %s1267_s9 = scalar_select %p1230_p2, %s1038_s14, %s41_s20  }
  0x64   : > { %p1369_p7 = scmp.ne.s32.totalorder %s1364_s26, 0 }
  0x65   : > { %s1272_s10 = sand.u32 (!%p1369_p7), 1, %s1034_s13   ;;  %p1370_p12 = scmp.ne.s32.totalorder (!%p1369_p7), %s1361_s23, 0 }
  0x66   : > { %197 = sbr.rel (%p1369_p7) target bundleno = 663 (0x297), region = 32  ;;  %s675_s18 = sshll.u32 (!%p1369_p7), %s1272_s10, 3 }
  0x67   : > { %s200_s6 = scalar_lea.sflag (!%p1369_p7), [#allocation3], %s1272_s10  ;;  %s203_s28 = scalar_lea.vmem (!%p1369_p7), [#allocation2], %s675_s18 }
  0x6d   : > { %1017 = dma.done.wait (%p1370_p12), %s200_s6, 128  }
  0x6e   : > { %1019 = vsyncadd (%p1370_p12), %s200_s6, 4294967168  ;;  %p1371_p2 = scmp.ne.s32.totalorder %s1359_s21, 0 }
  0x70   : > { %1021 = dma.done.wait (%p1371_p2), [#allocation6], 3088  }
  0x71   : > { %1023 = vsyncadd (%p1371_p2), [#allocation6], 4294964208  ;;  %v716_v0 = vld [vmem:[%s203_s28] sm:$0xff]   ;;  %v1059_v5 = vmov 0.0   ;;  %v1060_v31 = vmov 0   ;;  %vm1061_vm0 = vmmov 0  }
  0x72   : > { %v717_v1 = vunpack.c.l.bf16 %v716_v0  ;;  %v718_v2 = vunpack.c.h.bf16 %v716_v0  ;;  %v842_v3 = vld [vmem:[#allocation7 + $0x4] ss:$12 sps:$4 sm:$0xff]   ;;  %v844_v4 = vld [vmem:[#allocation7] ss:$12 sps:$4 sm:$0xff]   ;;  %728 = vmatprep.subr.bf16.mxu1 %v1059_v5  ;;  %v845_v6 = vld [vmem:[#allocation7 + $0x8] ss:$12 sps:$4 sm:$0xff]   ;;  %466 = vmatprep.mubr.bf16.mxu0 %v1060_v31 }
  0x73   : > { %v846_v7 = vld [vmem:[#allocation7 + $0x1c] ss:$12 sps:$4 sm:$0xff]   ;;  %434 = vmatprep.subr.bf16.mxu0 %v842_v3  ;;  %729 = vmatpush3.bf16.msra.mxu1 %v845_v6  ;;  %v848_v8 = vld [vmem:[#allocation7 + $0x18] ss:$12 sps:$4 sm:$0xff]   ;;  %v849_v9 = vld [vmem:[#allocation7 + $0x20] ss:$12 sps:$4 sm:$0xff]  }
  0x74   : > { %242 = vadd.xlane.f32.xlu0 %v717_v1  ;;  %435 = vmatpush1.bf16.msra.mxu0 %v844_v4  ;;  %v850_v18 = vld [vmem:[#allocation7 + $0x34] ss:$12 sps:$4 sm:$0xff]   ;;  %v852_v19 = vld [vmem:[#allocation7 + $0x30] ss:$12 sps:$4 sm:$0xff]   ;;  %v853_v20 = vld [vmem:[#allocation7 + $0x38] ss:$12 sps:$4 sm:$0xff]  }
  0x75   : > { %436 = vmatprep.subr.bf16.mxu0 %v846_v7  ;;  %730 = vmatprep.subr.bf16.mxu1 %v1059_v5  ;;  %v854_v21 = vld [vmem:[#allocation7 + $0x4c] ss:$12 sps:$4 sm:$0xff]   ;;  %v856_v22 = vld [vmem:[#allocation7 + $0x48] ss:$12 sps:$4 sm:$0xff]   ;;  %v857_v23 = vld [vmem:[#allocation7 + $0x50] ss:$12 sps:$4 sm:$0xff]  }
  0x76   : > { %v858_v24 = vld [vmem:[#allocation7 + $0x64] ss:$12 sps:$4 sm:$0xff]   ;;  %v860_v25 = vld [vmem:[#allocation7 + $0x60] ss:$12 sps:$4 sm:$0xff]   ;;  %v861_v26 = vld [vmem:[#allocation7 + $0x68] ss:$12 sps:$4 sm:$0xff]   ;;  %744 = vmatprep.mubr.msk.bf16.mxu1 %vm1061_vm0, %v1059_v5 }
  0x77   : > { %731 = vmatpush3.bf16.msra.mxu1 %v849_v9  ;;  %v862_v27 = vld [vmem:[#allocation7 + $0x7c] ss:$12 sps:$4 sm:$0xff]   ;;  %v864_v28 = vld [vmem:[#allocation7 + $0x78] ss:$12 sps:$4 sm:$0xff]   ;;  %v865_v29 = vld [vmem:[#allocation7 + $0x80] ss:$12 sps:$4 sm:$0xff]  }
  0x78   : > { %244 = vadd.xlane.f32.xlu0 %v718_v2  ;;  %437 = vmatpush1.bf16.msra.mxu0 %v848_v8  ;;  %v866_v30 = vld [vmem:[#allocation7 + $0x94] ss:$12 sps:$4 sm:$0xff]   ;;  %v868_v32 = vld [vmem:[#allocation7 + $0x90] ss:$12 sps:$4 sm:$0xff]   ;;  %v869_v33 = vld [vmem:[#allocation7 + $0x98] ss:$12 sps:$4 sm:$0xff]  }
  0x79   : > { %732 = vmatprep.subr.bf16.mxu1 %v1059_v5  ;;  %438 = vmatprep.subr.bf16.mxu0 %v850_v18  ;;  %v870_v34 = vld [vmem:[#allocation7 + $0xac] ss:$12 sps:$4 sm:$0xff]   ;;  %v872_v35 = vld [vmem:[#allocation7 + $0xa8] ss:$12 sps:$4 sm:$0xff]   ;;  %v873_v36 = vld [vmem:[#allocation7 + $0xb0] ss:$12 sps:$4 sm:$0xff]  }
  0x7a   : > { %v678_v46 = vld [vmem:[#allocation5] ss:$0 sm:$0xff]  ;;  %s748_s20 = smul.u32 24, %s1272_s10  ;;  %s543_s5 = scalar_lea.sflag [#allocation4], %s1272_s10 }
  0x7b   : > { %733 = vmatpush3.bf16.msra.mxu1 %v853_v20  ;;  %s749_s26 = smul.u32 384, %s1042_s15  ;;  %p1372_p10 = scmp.ne.s32.totalorder %s1362_s24, 0 }
  0x7c   : > { %439 = vmatpush1.bf16.msra.mxu0 %v852_v19  ;;  %734 = vmatprep.subr.bf16.mxu1 %v1059_v5  ;;  %s233_s21 = scalar_lea.vmem [#allocation8], %s748_s20  ;;  %s1062_s22 = smov [#allocation8]  }
  0x7d   : > { %440 = vmatprep.subr.bf16.mxu0 %v854_v21  ;;  %s559_s23 = sshll.u32 %s233_s21, 4  ;;  %s1300_s11 = scalar_lea.hbm %s1352_s3, %s749_s26  ;;  %s1295_s23 = int_to_ptr.vmem [resolvable:$true] %s559_s23 }
  0x7e   : > { %s964_s19 = scalar_lea.vmem %s1295_s23, 384  ;;  %s968_s4 = sshll.u32 %s1062_s22, 4  ;;  %s969_s4 = int_to_ptr.vmem [resolvable:$false] %s968_s4 }
  0x7f   : > { %735 = vmatpush3.bf16.msra.mxu1 %v857_v23  ;;  %p965_p3 = scmp.ne.s32.totalorder %s1295_s23, %s964_s19  ;;  %s970_s30 = scalar_lea.vmem %s969_s4, 768 }
  0x80   : > { %441 = vmatpush1.bf16.msra.mxu0 %v856_v22  ;;  %736 = vmatprep.subr.bf16.mxu1 %v1059_v5  ;;  %p971_p0 = scmp.lt.s32.totalorder %s1295_s23, %s969_s4  ;;  %p972_p6 = scmp.lt.s32.totalorder %s970_s30, %s964_s19 }
  0x81   : > { %442 = vmatprep.subr.bf16.mxu0 %v858_v24  ;;  %p966_p11 = pnand %p965_p3, %p1372_p10 }
  0x82   : > { %p973_p9 = por %p972_p6, %p971_p0 }
  0x83   : > { %737 = vmatpush3.bf16.msra.mxu1 %v861_v26  ;;  %p967_p1 = pneg %p966_p11 }
  0x84   : > { %443 = vmatpush1.bf16.msra.mxu0 %v860_v25  ;;  %738 = vmatprep.subr.bf16.mxu1 %v1059_v5 }
  0x85   : > { %444 = vmatprep.subr.bf16.mxu0 %v862_v27  ;;  %p974_p8 = pnand %p973_p9, %p967_p1 }
  0x87   : > { %739 = vmatpush3.bf16.msra.mxu1 %v865_v29 }
  0x88   : > { %445 = vmatpush1.bf16.msra.mxu0 %v864_v28  ;;  %740 = vmatprep.subr.bf16.mxu1 %v1059_v5 }
  0x89   : > { %446 = vmatprep.subr.bf16.mxu0 %v866_v30 }
  0x8b   : > { %741 = vmatpush3.bf16.msra.mxu1 %v869_v33 }
  0x8c   : > { %447 = vmatpush1.bf16.msra.mxu0 %v868_v32  ;;  %742 = vmatprep.subr.bf16.mxu1 %v1059_v5 }
  0x8d   : > { %448 = vmatprep.subr.bf16.mxu0 %v870_v34 }
  0x8f   : > { %743 = vmatpush3.bf16.msra.mxu1 %v873_v36 }
  0x90   : > { %449 = vmatpush1.bf16.msra.mxu0 %v872_v35 }
 0x101   : > { %v243_v10 = vpop.xlane.xlu0 %242 }
 0x102   : > { %v247_v11 = vmul.f32 0.0078125, %v243_v10 }
 0x104   : > { %v249_v12 = vsub.f32 %v717_v1, %v247_v11 }
 0x105   : > { %v245_v13 = vpop.xlane.xlu0 %244 }
 0x106   : > { %v248_v14 = vmul.f32 0.0078125, %v245_v13  ;;  %v251_v15 = vmul.f32 %v249_v12, %v249_v12 }
 0x108   : > { %v250_v16 = vsub.f32 %v718_v2, %v248_v14  ;;  %253 = vadd.xlane.f32.xlu1 %v251_v15 }
 0x10a   : > { %v252_v17 = vmul.f32 %v250_v16, %v250_v16 }
 0x10c   : > { %255 = vadd.xlane.f32.xlu1 %v252_v17 }
 0x195   : > { %v254_v37 = vpop.xlane.xlu1 %253 }
 0x196   : > { %v257_v38 = vmul.f32 0.0078125, %v254_v37 }
 0x198   : > { %v259_v39 = vadd.f32 1e-05, %v257_v38 }
 0x199   : > { %v256_v40 = vpop.xlane.xlu1 %255 }
 0x19a   : > { %874 = vrsqrt.f32 %v259_v39  ;;  %v258_v41 = vmul.f32 0.0078125, %v256_v40 }
 0x19c   : > { %v260_v42 = vadd.f32 1e-05, %v258_v41 }
 0x19e   : > { %876 = vrsqrt.f32 %v260_v42 }
 0x1a4   : > { %v875_v43 = vpop.eup %874 }
 0x1a5   : > { %v263_v44 = vmul.f32 %v875_v43, %v249_v12 }
 0x1a7   : > { %v271_v48 = vmul.f32 %v678_v46, %v263_v44 }
 0x1a8   : > { %v877_v45 = vpop.eup %876 }
 0x1a9   : > { %v264_v47 = vmul.f32 %v877_v45, %v250_v16 }
 0x1ab   : > { %v272_v49 = vmul.f32 %v678_v46, %v264_v47 }
 0x1ad   : > { %v273_v50 = vpack.c.bf16 %v272_v49, %v271_v48 }
 0x1af   : > { %467 = vmatmul.mubr.bf16.vlgmr.msra.gmra.mrb[0].mxu0 %v273_v50  ;;  %745 = vmatmul.mubr.bf16.vlgmr.msra.gmra.mrb[0].mxu1 %v273_v50 }
 0x282   : > { %v468_v51 = vpop.f32.mrb[0].mxu0  ;;  %v511_v52 = vpop.f32.mrb[0].mxu1 }
 0x283   : > { %v712_v53 = vpack.c.bf16 %v511_v52, %v511_v52  ;;  %v470_v54 = vpop.f32.mrb[1].mxu0  ;;  %v746_v55 = vpop.f32.mrb[1].mxu1 }
 0x284   : > { %v711_v56 = vpack.c.bf16 %v470_v54, %v468_v51  ;;  %v472_v57 = vpop.f32.mrb[2].mxu0  ;;  %v514_v58 = vpop.f32.mrb[2].mxu1 }
 0x285   : > { %539 = vst [vmem:[%s233_s21 + $0x8] sm:$0xf] %v712_v53  ;;  %v714_v59 = vpack.c.bf16 %v514_v58, %v514_v58  ;;  %v474_v60 = vpop.f32.mrb[3].mxu0  ;;  %v747_v61 = vpop.f32.mrb[3].mxu1 }
 0x286   : > { %538 = vst [vmem:[%s233_s21] sm:$0xff] %v711_v56  ;;  %v713_v62 = vpack.c.bf16 %v474_v60, %v472_v57 }
 0x287   : > { %541 = vst [vmem:[%s233_s21 + $0x14] sm:$0xf] %v714_v59 }
 0x288   : > { %540 = vst [vmem:[%s233_s21 + $0xc] sm:$0xff] %v713_v62 }
 0x289   : > { %977 = shalt.err (!%p974_p8)
}
 0x28a   : > { %s978_s27 = scalar_lea.hbm %s1300_s11, 384  ;;  %s982_s6 = scalar_lea.hbm %s1352_s3, 768 }
 0x28b   : > { %p979_p13 = scmp.ne.s32.totalorder %s1300_s11, %s978_s27  ;;  %p983_p7 = scmp.lt.u32.totalorder %s1300_s11, %s1352_s3 }
 0x28c   : > { %p984_p12 = scmp.lt.u32.totalorder %s982_s6, %s978_s27  ;;  %p986_p3 = scmp.lt.u32.totalorder %s978_s27, %s1300_s11 }
 0x28d   : > { %p980_p4 = pnand %p979_p13, %p1372_p10 }
 0x28e   : > { %p985_p2 = por %p984_p12, %p983_p7 }
 0x28f   : > { %p981_p5 = pneg %p980_p4 }
 0x290   : > { %p987_p11 = por %p986_p3, %p985_p2 }
 0x292   : > { %p988_p1 = pnand %p987_p11, %p981_p5 }
 0x294   : > { %991 = shalt.err (!%p988_p1)
}
 0x295   : > { %s1063_s21 = smov 192   ;;  %s1064_s26 = smov 12  }
 0x296   : > { %760 = dma.vmem_to_hbm [thread:$0]  (%p1372_p10), %s1295_s23, 384, %s1300_s11, %s543_s5, %s1063_s21, %s1063_s21, %s1064_s26  }
 0x297 PF: > { %s574_s15 = sand.u32 1, %s1030_s12   ;;  %p1373_p0 = scmp.ne.s32.totalorder %s1363_s25, 0 }
 0x298   : > { %p1374_p6 = scmp.ge.s32.totalorder %s1050_s17, 2  ;;  %s575_s29 = scalar_lea.sflag [#allocation4], %s574_s15 }
 0x29a   : > { %p774_p9 = pnand %p1374_p6, %p1373_p0 }
 0x29c   : > { %1025 = dma.done.wait (!%p774_p9), %s575_s29, 384  }
 0x29d   : > { %1027 = vsyncadd (!%p774_p9), %s575_s29, 4294966912  ;;  %s20_s17 = sadd.s32 1, %s1050_s17   ;;  %s1375_s12 = smov %s1034_s13 }
 0x29e   : > { %p17_p8 = scmp.ge.s32.totalorder %s20_s17, 4   ;;  %s1376_s13 = smov %s1038_s14 }
 0x29f   : > { %s1377_s14 = smov %s1267_s9  ;;  %s1378_s15 = smov %s1046_s16 }
 0x2a0   : > { %s1379_s16 = smov %s1381_s7  ;;  %19 = sbr.rel (!%p17_p8) target bundleno = 7 (0x7), region = 85 }
 0x2a7   :  { %580 = vsyncpa [#allocation3], 1 }
 0x2a8   :  { %582 = vsyncpa [#allocation3 + $0x1], 1 }
 0x2a9   :  { %583 = vsyncpa [#allocation6], 1 }
 0x2aa   :  { %584 = vsyncpa [#allocation4], 1 }
 0x2ab   :  { %586 = vsyncpa [#allocation4 + $0x1], 1 }

</bundles_post_ra>
